<compile_context>
chip_gen: v5e
topology: v5e:2x2
jax: 0.10.0
libtpu: 0.0.40
codegen_flags: <defaults>
</compile_context>

<pallas_src>
import math

import jax
import jax.numpy as jnp
from jax.experimental import pallas as pl
from jax.experimental.pallas import tpu as pltpu

_LANES = 128


def _scale_kernel(x_ref, gamma_ref, o_ref):
    # (tile_r, tile_c) * (1, tile_c): pure VPU elementwise multiply, gamma is
    # broadcast along the sublane axis.  Mixed input dtypes promote in-kernel.
    o_ref[...] = (x_ref[...] * gamma_ref[...]).astype(o_ref.dtype)


def _cdiv(a, b):
    return -(-a // b)


def _round_up(n, m):
    return _cdiv(n, m) * m


def _round_down(n, m):
    return (n // m) * m


def _min_sublanes(*dtypes):
    # Native sublane tile height: 8 (4-byte), 16 (2-byte), 32 (1-byte) dtypes.
    return max(8, *(32 // jnp.dtype(d).itemsize for d in dtypes))


def _scale_2d(x2d, gamma_row, out_dtype, tile_r, tile_c):
    """pallas_call over a 2-D view: out[r, c] = x[r, c] * gamma_row[0, c]."""
    rows, cols = x2d.shape
    grid = (_cdiv(rows, tile_r), _cdiv(cols, tile_c))

    in_item = jnp.dtype(x2d.dtype).itemsize
    out_item = jnp.dtype(out_dtype).itemsize
    # Double-buffered working set: 2 * (in block + out block + gamma block) + margin.
    working = 2 * (tile_r * tile_c * (in_item + out_item) + tile_c * out_item)
    vmem_limit = int(min(max(working + (4 << 20), 16 << 20), 40 << 20))

    return pl.pallas_call(
        _scale_kernel,
        out_shape=jax.ShapeDtypeStruct((rows, cols), out_dtype),
        grid_spec=pltpu.PrefetchScalarGridSpec(
            num_scalar_prefetch=0,
            grid=grid,
            in_specs=[
                pl.BlockSpec((tile_r, tile_c), lambda i, j: (i, j)),
                pl.BlockSpec((1, tile_c), lambda i, j: (0, j)),
            ],
            out_specs=pl.BlockSpec((tile_r, tile_c), lambda i, j: (i, j)),
        ),
        compiler_params=pltpu.CompilerParams(
            # TODO(synk): verify in a profile that "parallel" shards the row axis
            # across both v7x TensorCores; otherwise add an explicit core axis.
            dimension_semantics=("parallel", "parallel"),
            vmem_limit_bytes=vmem_limit,
        ),
    )(x2d, gamma_row)


def layer_scale(x, gamma, *, step_bytes=16 * 1024 * 1024):
    """LayerScale forward: out = x * gamma, gamma broadcast along the last axis.

    step_bytes ~= HBM bytes moved (input + output) per grid step.
    """
    orig_shape = x.shape
    D = orig_shape[-1]
    assert gamma.shape == (D,), "gamma must have shape (dim,)"

    out_dtype = jnp.result_type(x.dtype, gamma.dtype)
    gamma = gamma.astype(out_dtype)
    if x.size == 0:
        return (x.astype(out_dtype) * gamma).reshape(orig_shape)

    x_item = jnp.dtype(x.dtype).itemsize
    out_item = jnp.dtype(out_dtype).itemsize
    bytes_per_elem = x_item + out_item
    sub = _min_sublanes(x.dtype, out_dtype)

    total = x.size
    N = total // D                       # number of feature vectors

    W = math.lcm(D, _LANES)              # lane-dense packed row width
    reps = W // D                        # feature vectors per packed row

    if W * sub * bytes_per_elem > step_bytes:
        # --- wide-feature fallback (huge D with few common factors with 128) ----
        # Tile the natural (N, D) view over rows *and* lanes; only the last lane
        # block (D % tile_c) sees masked stores, a small fraction of the traffic.
        x2d = x.reshape(N, D)                                    # free reshape
        tile_c_max = max(
            _LANES, _round_down(step_bytes // (sub * bytes_per_elem), _LANES))
        tile_c = min(_round_up(D, _LANES), tile_c_max)
        if N < sub:
            tile_r = N                                           # single full block
        else:
            tile_r = max(sub,
                         _round_down(step_bytes // (tile_c * bytes_per_elem), sub))
            tile_r = min(tile_r, _round_up(N, sub))
        out2d = _scale_2d(x2d, gamma.reshape(1, D), out_dtype, tile_r, tile_c)
        return out2d.reshape(orig_shape)

    # --- lane-dense packed path ---------------------------------------------------
    rows = N // reps                     # complete packed rows
    n_tail = N - rows * reps             # ragged feature vectors (< reps <= 128)

    if rows == 0:
        # Fewer elements than one packed row: not worth a kernel launch.
        return (x * gamma).reshape(orig_shape)

    gamma_row = jnp.tile(gamma, reps).reshape(1, W)

    row_bytes = W * bytes_per_elem
    if rows < sub:
        tile_r = rows                                            # single full block
    else:
        tile_r = max(sub, _round_down(step_bytes // row_bytes, sub))
        # Prefer >= 4 grid steps (>= 2 per TensorCore on v7x) when data allows.
        tile_r = min(tile_r, max(sub, _round_up(_cdiv(rows, 4), sub)))
        tile_r = min(tile_r, _round_up(rows, sub))

    x_flat = x.reshape(-1)
    if n_tail == 0:
        x_main = x_flat.reshape(rows, W)                         # free reshape, no copy
    else:
        # TODO(synk): the slice + concatenate below still cost one extra pass over the
        # main body on ragged shapes; fusing into the producer's epilogue avoids it.
        x_main = x_flat[: rows * W].reshape(rows, W)

    out_main = _scale_2d(x_main, gamma_row, out_dtype, tile_r, W)

    if n_tail == 0:
        return out_main.reshape(orig_shape)

    tail = x_flat[rows * W:].reshape(n_tail, D)
    out_tail = (tail * gamma).reshape(-1)                        # tiny plain-jnp tail
    return jnp.concatenate([out_main.reshape(-1), out_tail]).reshape(orig_shape)


if __name__ == "__main__":
    # Mirrors LayerScale(dim=32, init_values=1e-5).
    dim = 32
    init_values = 1e-5
    gamma = init_values * jnp.ones((dim,), dtype=jnp.float32)

    key = jax.random.PRNGKey(0)
    k0, k1, k2 = jax.random.split(key, 3)

    # Typical transformer-token input: (batch=2, seq=64, hidden=32).
    x = jax.random.normal(k0, (2, 64, dim), dtype=jnp.float32)
    out = jax.block_until_ready(layer_scale(x, gamma))
    assert out.shape == x.shape and out.dtype == x.dtype
    assert jnp.allclose(out, x * gamma, rtol=1e-6, atol=0.0), "mismatch vs reference"

    # Ragged path: token count not a multiple of the packing factor (128 // 32 = 4).
    x2 = jax.random.normal(k1, (3, 11, dim), dtype=jnp.float32)
    out2 = jax.block_until_ready(layer_scale(x2, gamma))
    assert jnp.allclose(out2, x2 * gamma, rtol=1e-6, atol=0.0), "ragged-path mismatch"

    # Mixed precision: bf16 activations, f32 gamma -> f32 output (PyTorch-like promotion).
    x3 = jax.random.normal(k2, (2, 64, dim), dtype=jnp.bfloat16)
    out3 = jax.block_until_ready(layer_scale(x3, gamma))
    assert out3.dtype == jnp.float32
    assert jnp.allclose(out3, x3.astype(jnp.float32) * gamma, rtol=1e-6, atol=0.0), \
        "mixed-precision mismatch"

    print("KERNEL_OK")
</pallas_src>

<mosaic_0001>
module attributes {stable_mosaic.version = 11 : i64} {
  func.func @_scale_kernel(%arg0: i32, %arg1: i32, %arg2: memref<8x128xf32, #tpu.memory_space<vmem>>, %arg3: memref<1x128xf32, #tpu.memory_space<vmem>>, %arg4: memref<8x128xf32, #tpu.memory_space<vmem>>) attributes {dimension_semantics = [#tpu.dimension_semantics<parallel>, #tpu.dimension_semantics<parallel>], iteration_bounds = array<i64: 4, 1>, scalar_prefetch = 0 : i64, scratch_operands = 0 : i64, tpu.core_type = #tpu.core_type<tc>, window_params = [{transform_indices = @transform_0, window_bounds = array<i64: 8, 128>}, {transform_indices = @transform_1, window_bounds = array<i64: 1, 128>}, {transform_indices = @transform_2, window_bounds = array<i64: 8, 128>}]} {
    %c0 = arith.constant 0 : index
    %c0_0 = arith.constant 0 : index
    %0 = vector.load %arg2[%c0, %c0_0] : memref<8x128xf32, #tpu.memory_space<vmem>>, vector<8x128xf32>
    %c0_1 = arith.constant 0 : index
    %c0_2 = arith.constant 0 : index
    %1 = vector.load %arg3[%c0_1, %c0_2] : memref<1x128xf32, #tpu.memory_space<vmem>>, vector<1x128xf32>
    %2 = vector.broadcast %1 : vector<1x128xf32> to vector<8x128xf32>
    %3 = arith.mulf %0, %2 : vector<8x128xf32>
    %c0_3 = arith.constant 0 : index
    %c0_4 = arith.constant 0 : index
    %4 = vector.load %arg4[%c0_3, %c0_4] : memref<8x128xf32, #tpu.memory_space<vmem>>, vector<8x128xf32>
    tpu.vector_store %arg4[%c0_3, %c0_4], %3 {strides = array<i32>} : memref<8x128xf32, #tpu.memory_space<vmem>>, vector<8x128xf32>,
    return
  }
  func.func @transform_0(%arg0: i32, %arg1: i32) -> (i32, i32) {
    %c0_i32 = arith.constant 0 : i32
    return %arg0, %arg1 : i32, i32
  }
  func.func @transform_1(%arg0: i32, %arg1: i32) -> (i32, i32) {
    %c0_i32 = arith.constant 0 : i32
    %c0_i32_0 = arith.constant 0 : i32
    return %c0_i32, %arg1 : i32, i32
  }
  func.func @transform_2(%arg0: i32, %arg1: i32) -> (i32, i32) {
    %c0_i32 = arith.constant 0 : i32
    return %arg0, %arg1 : i32, i32
  }
}

</mosaic_0001>

<bundles_post_ra>
// kernel: tpu_custom_call.1
= control target key start
LH: loop header
LB: loop body
LE: loop exit
PB: predicated region body
PF: predicated region fallthrough
CT: control target
= control target key end

     0   :  { %7 = vsyncpa [#allocation3], 0  ;;  %s714_s0 = inlined_call_operand.hbm [shape: f32[32,128], index: 0, kind: input, shape index: {}]   ;;  %s715_s1 = inlined_call_operand.hbm [shape: f32[1,128], index: 1, kind: input, shape index: {}]   ;;  %s716_s2 = inlined_call_operand.hbm [shape: f32[32,128], index: 2, kind: output, shape index: {}]  }
   0x1   :  { %9 = vsyncpa [#allocation3 + $0x1], 0 }
   0x2   :  { %10 = vsyncpa [#allocation6], 0 }
   0x3   :  { %11 = vsyncpa [#allocation4], 0 }
   0x4   :  { %13 = vsyncpa [#allocation4 + $0x1], 0  ;;  %s567_s9 = smov 0   ;;  %s569_s10 = smov 0  }
   0x5   :  { %s571_s11 = smov 0   ;;  %s573_s12 = smov 0  }
   0x6   :  { %s575_s13 = smov 0   ;;  %s577_s14 = smov 0  }
   0x7 LB: > { %s314_s15 = sadd.s32 4294967295, %s549_s14   ;;  %s315_s16 = sadd.s32 4294967294, %s549_s14   ;;  %s549_s14 = sphi %s577_s14, %s19_s14   ;;  %s545_s13 = sphi %s575_s13, %s728_s13   ;;  %s541_s12 = sphi %s573_s12, %s727_s12   ;;  %s537_s11 = sphi %s571_s11, %s726_s11   ;;  %s533_s10 = sphi %s569_s10, %s725_s10   ;;  %s529_s9 = sphi %s567_s9, %s724_s9  }
   0x8   : > { %p53_p0 = scmp.ne.s32.totalorder %s533_s10, %s529_s9  ;;  %p601_p1 = scmp.eq.s32.totalorder %s314_s15, 0 }
   0x9   : > { %p605_p2 = scmp.eq.s32.totalorder %s314_s15, 3  ;;  %p111_p3 = scmp.eq.s32.totalorder %s315_s16, 3 }
   0xa   : > { %p611_p4 = por %p601_p1, %p53_p0  ;;  %p316_p5 = scmp.ge.s32.totalorder %s549_s14, 1 }
   0xb   : > { %p616_p6 = por %p111_p3, %p53_p0  ;;  %p118_p7 = scmp.lt.s32.totalorder %s549_s14, 5 }
   0xc   : > { %s131_s23 = sshll.u32 %s715_s1, 4  ;;  %s551_s25 = smov [#allocation5]   ;;  %s132_s23 = int_to_ptr.hbm [resolvable:$true] %s131_s23 }
   0xd   : > { %p624_p8 = pnand %p316_p5, %p118_p7  ;;  %s133_s26 = sshll.u32 %s551_s25, 4  ;;  %s134_s26 = int_to_ptr.vmem [resolvable:$true] %s133_s26 }
   0xe   : > { %s31_s27 = sadd.s32 1, %s545_s13  ;;  %s40_s28 = sadd.s32 1, %s537_s11 }
   0xf   : > { %p337_p9 = pneg %p624_p8  ;;  %p33_p11 = scmp.ge.s32.totalorder %s31_s27, 4 }
  0x10   : > { %p47_p12 = scmp.ne.s32.totalorder %s537_s11, %s533_s10  ;;  %p48_p13 = scmp.eq.s32.totalorder %s549_s14, 0 }
  0x11   : > { %p338_p10 = pnand %p337_p9, %p601_p1  ;;  %s730_s27 = smov (%p33_p11, %s31_s27), 0 }
  0x12   : > { %p639_p0 = por %p48_p13, %p47_p12  ;;  %p645_p3 = por %p605_p2, %p47_p12 }
  0x13   : > { %340 = dma.hbm_to_vmem [thread:$0]  (!%p338_p10), %s132_s23, 16, %s134_s26, [#allocation6]  }
  0x14   : > { %s35_s3 = ssub.s32 %s545_s13, %s730_s27  ;;  %p350_p5 = scmp.lt.s32.totalorder %s549_s14, 4 }
  0x15   : > { %p38_p7 = scmp.eq.s32.totalorder %s35_s3, 0  ;;  %s144_s4 = sand.u32 1, %s537_s11  }
  0x16   : > { %s319_s5 = sshll.u32 %s144_s4, 3  ;;  %s320_s7 = sshll.u32 %s545_s13, 3 }
  0x17   : > { %s654_s6 = scalar_select %p38_p7, %s537_s11, %s40_s28  }
  0x18   : > { %s153_s16 = scalar_lea.hbm %s714_s0, %s320_s7  ;;  %s148_s21 = scalar_lea.vmem [#allocation2], %s319_s5 }
  0x19   : > { %s157_s22 = sshll.u32 %s148_s21, 4  ;;  %s155_s18 = sshll.u32 %s153_s16, 4  ;;  %s158_s22 = int_to_ptr.vmem [resolvable:$true] %s157_s22  ;;  %s156_s18 = int_to_ptr.hbm [resolvable:$true] %s155_s18 }
  0x1a   : > { %p342_p2 = pnand %p350_p5, %p639_p0  ;;  %s145_s23 = scalar_lea.sflag [#allocation3], %s144_s4 }
  0x1b   : > { %166 = sbr.rel (%p624_p8) target bundleno = 50 (0x32), region = 28  ;;  %s665_s25 = sand.u32 (!%p624_p8), 1, %s533_s10  }
  0x1c   : > { %344 = dma.hbm_to_vmem [thread:$0]  (!%p342_p2), %s156_s18, 128, %s158_s22, %s145_s23  }
  0x1d   : > { %s322_s26 = sshll.u32 (!%p624_p8), %s665_s25, 3  ;;  %s169_s28 = scalar_lea.sflag (!%p624_p8), [#allocation3], %s665_s25 }
  0x1e   : > { %s172_s3 = scalar_lea.vmem (!%p624_p8), [#allocation2], %s322_s26 }
  0x20   : > { %516 = dma.done.wait (%p611_p4), %s169_s28, 128  }
  0x21   : > { %518 = vsyncadd (%p611_p4), %s169_s28, 4294967168 }
  0x22   : > { %520 = dma.done.wait (%p601_p1), [#allocation6], 16  }
  0x23   : > { %522 = vsyncadd (%p601_p1), [#allocation6], 4294967280  ;;  %s326_s24 = sshll.u32 %s541_s12, 3  ;;  %s198_s7 = scalar_lea.vmem [#allocation7], %s322_s26  ;;  %v199_v0 = vld [vmem:[%s172_s3] sm:$0xff] }
  0x24   : > { %s218_s5 = scalar_lea.hbm %s716_s2, %s326_s24  ;;  %s220_s8 = sshll.u32 %s198_s7, 4  ;;  %v402_v1 = vld [vmem:[#allocation5] ss:$0 sm:$0xff]  ;;  %s221_s8 = int_to_ptr.vmem [resolvable:$true] %s220_s8 }
  0x25   : > { %s222_s15 = sshll.u32 %s218_s5, 4  ;;  %v204_v2 = vmul.f32 %v402_v1, %v199_v0  ;;  %s207_s19 = scalar_lea.sflag [#allocation4], %s665_s25  ;;  %s223_s15 = int_to_ptr.hbm [resolvable:$true] %s222_s15 }
  0x26   : > { %s477_s17 = sshra.s32 %s223_s15, 4  ;;  %s483_s22 = scalar_lea.hbm %s716_s2, 32  ;;  %s478_s17 = int_to_ptr.hbm [resolvable:$true] %s477_s17 }
  0x27   : > { %205 = vst [vmem:[%s198_s7] sm:$0xff] %v204_v2  ;;  %s479_s16 = scalar_lea.hbm %s478_s17, 8  ;;  %p484_p9 = scmp.lt.s32.totalorder %s478_s17, %s716_s2 }
  0x28   : > { %p480_p1 = scmp.ne.s32.totalorder %s478_s17, %s479_s16  ;;  %p485_p10 = scmp.lt.s32.totalorder %s483_s22, %s479_s16 }
  0x2a   : > { %p481_p4 = pnand %p480_p1, %p645_p3  ;;  %p486_p11 = por %p485_p10, %p484_p9 }
  0x2c   : > { %p482_p8 = pneg %p481_p4 }
  0x2e   : > { %p487_p12 = pnand %p486_p11, %p482_p8 }
  0x30   : > { %490 = shalt.err (!%p487_p12)
}
  0x31   : > { %335 = dma.vmem_to_hbm [thread:$0]  (%p645_p3), %s221_s8, 128, %s223_s15, %s207_s19  }
  0x32 PF: > { %p352_p13 = scmp.ge.s32.totalorder %s549_s14, 2  ;;  %s234_s25 = sand.u32 1, %s529_s9  }
  0x33   : > { %s235_s26 = scalar_lea.sflag [#allocation4], %s234_s25 }
  0x34   : > { %p346_p0 = pnand %p352_p13, %p616_p6 }
  0x36   : > { %p347_p5 = pneg %p346_p0 }
  0x38   : > { %524 = dma.done.wait (%p347_p5), %s235_s26, 128  }
  0x39   : > { %526 = vsyncadd (%p347_p5), %s235_s26, 4294967168  ;;  %s19_s14 = sadd.s32 1, %s549_s14   ;;  %s724_s9 = smov %s533_s10 }
  0x3a   : > { %p16_p7 = scmp.ge.s32.totalorder %s19_s14, 6   ;;  %s725_s10 = smov %s537_s11 }
  0x3b   : > { %s726_s11 = smov %s654_s6  ;;  %s727_s12 = smov %s545_s13 }
  0x3c   : > { %s728_s13 = smov %s730_s27  ;;  %18 = sbr.rel (!%p16_p7) target bundleno = 7 (0x7), region = 78 }
  0x41   :  { %241 = vsyncpa [#allocation3], 1 }
  0x42   :  { %243 = vsyncpa [#allocation3 + $0x1], 1 }
  0x43   :  { %244 = vsyncpa [#allocation6], 1 }
  0x44   :  { %245 = vsyncpa [#allocation4], 1 }
  0x45   :  { %247 = vsyncpa [#allocation4 + $0x1], 1 }

</bundles_post_ra>
